<compile_context>
chip_gen: v6e
topology: v6e:2x2x1
jax: 0.10.0
libtpu: 0.0.40
codegen_flags: <defaults>
</compile_context>

<pallas_src>
import functools

import jax
import jax.numpy as jnp
from jax import lax
from jax.experimental import pallas as pl
from jax.experimental.pallas import tpu as pltpu

EPS = 1e-12      # eps used in _compute_statistics
BN_EPS = 1e-5    # nn.BatchNorm1d default eps


def _asp_kernel(cnt_ref,                 # scalar-prefetch: [N] int32 valid-frame counts (SMEM)
                x_ref,                   # [nb, C, TL] f32
                w1x_ref,                 # [A, C]  (mm_dtype)  W1 columns acting on x
                w1ms_ref,                # [A, 2C] f32         W1 columns acting on [mean; std]
                aux_ref,                 # [A, 3]  f32         columns: (b1, bn_scale, bn_shift)
                w2_ref,                  # [C, A]  (mm_dtype)
                lshift_ref,              # [C, 1]  f32         -sum_a |w2[c,a]| (softmax shift)
                out_ref,                 # [nb, 1, 2C] f32     lane-dense output
                acc1, acc2, l_sc, mean0, b1eff,   # VMEM scratch (persist across grid steps)
                *, total_len, n_lt, mm_dtype, oob_guard):
    p = pl.program_id(1)      # 0: masked global mean/std, 1: attention + attentive stats
    lt = pl.program_id(2)     # position along the time-tile axis of this pass
    nb, C, TL = x_ref.shape

    # Actual time-tile index of the resident block (pass 1 walks tiles in reverse so the
    # boundary tile is reused between the two passes without a refetch).
    t_idx = lt + p * ((n_lt - 1) - 2 * lt)
    base = t_idx * TL
    col_row = lax.broadcasted_iota(jnp.int32, (1, TL), 1) + base    # (1, TL) global column idx
    col_col = lax.broadcasted_iota(jnp.int32, (TL, 1), 0) + base    # (TL, 1)
    b0 = pl.program_id(0) * nb

    def get_x(i):
        x = x_ref[i]
        if oob_guard:
            # zero out-of-bounds padding columns of the boundary tile (stale VMEM otherwise)
            x = jnp.where(col_row < total_len, x, 0.0)
        return x

    # ---------------- pass 0: masked global mean/std -> folded TDNN bias ----------------
    @pl.when(p == 0)
    def _pass0():
        @pl.when(lt == 0)
        def _init():
            acc1[...] = jnp.zeros_like(acc1)
            acc2[...] = jnp.zeros_like(acc2)

        for i in range(nb):
            n_i = cnt_ref[b0 + i]
            mcol = (col_col < n_i).astype(jnp.float32)          # (TL, 1) length-mask column
            x = get_x(i)
            # mask-fused reductions on the (otherwise idle) MXU
            acc1[i] = acc1[i] + jnp.dot(x, mcol, preferred_element_type=jnp.float32)
            acc2[i] = acc2[i] + jnp.dot(x * x, mcol, preferred_element_type=jnp.float32)

        @pl.when(lt == n_lt - 1)
        def _fin0():
            for i in range(nb):
                n_f = jnp.maximum(cnt_ref[b0 + i].astype(jnp.float32), 1.0)
                mean = acc1[i] / n_f                             # (C, 1) exact division
                var = acc2[i] / n_f - mean * mean
                std = jnp.sqrt(jnp.maximum(var, EPS))
                ms = jnp.concatenate([mean, std], axis=0)        # (2C, 1)
                # b1_eff = b1 + W1_[mean|std] @ [mean; std]   (constant over L)
                b1eff[i] = aux_ref[:, 0:1] + jnp.dot(
                    w1ms_ref[...], ms, preferred_element_type=jnp.float32)
                mean0[i] = mean
                # reset accumulators for pass 1
                acc1[i] = jnp.zeros_like(mean)
                acc2[i] = jnp.zeros_like(mean)
                l_sc[i] = jnp.zeros_like(mean)

    # ---------- pass 1: attention logits + attentive statistics (bounded softmax) -------
    @pl.when(p == 1)
    def _pass1():
        bn_scale = aux_ref[:, 1:2]       # (A, 1)
        bn_shift = aux_ref[:, 2:3]       # (A, 1)
        for i in range(nb):
            n_i = cnt_ref[b0 + i]
            maskf = (col_row < n_i).astype(jnp.float32)          # (1, TL)
            x = get_x(i)
            # TDNNBlock: Conv1d(k=1) -> ReLU -> folded BatchNorm -> tanh
            h = jnp.dot(w1x_ref[...], x.astype(mm_dtype),
                        preferred_element_type=jnp.float32)      # (A, TL)
            h = jnp.maximum(h + b1eff[i], 0.0)
            h = jnp.tanh(h * bn_scale + bn_shift)
            # Conv1d(k=1) -> shifted logits: shift = -(sum_a |w2|), so w2@h + shift <= 0
            # (|tanh| <= 1) and exp() never overflows; softmax is shift-invariant per
            # channel so this equals softmax(w2@h + b2) of the reference.
            a = jnp.dot(w2_ref[...], h.astype(mm_dtype),
                        preferred_element_type=jnp.float32) + lshift_ref[...]   # (C, TL)
            pv = jnp.exp(a) * maskf                              # masked un-normalized weights
            y = x - mean0[i]                                     # center by pass-0 mean
            py = pv * y
            l_sc[i] = l_sc[i] + jnp.sum(pv, axis=1, keepdims=True)
            acc1[i] = acc1[i] + jnp.sum(py, axis=1, keepdims=True)
            acc2[i] = acc2[i] + jnp.sum(py * y, axis=1, keepdims=True)

        @pl.when(lt == n_lt - 1)
        def _fin1():
            for i in range(nb):
                inv_l = 1.0 / l_sc[i]                            # exact; once per batch item
                d = acc1[i] * inv_l                              # E_attn[x - mean0]
                mean2 = mean0[i] + d
                var2 = acc2[i] * inv_l - d * d
                std2 = jnp.sqrt(jnp.maximum(var2, EPS))
                pooled = jnp.concatenate([mean2, std2], axis=0)  # (2C, 1)
                out_ref[i] = jnp.reshape(pooled, (1, 2 * C))     # lane-dense row


def _round_up(n, m):
    return ((n + m - 1) // m) * m


def _vmem_capacity_bytes():
    try:
        info = pltpu.get_tpu_info()
        for attr in ("vmem_capacity_bytes", "vmem_bytes", "vmem_size_bytes", "vmem_capacity"):
            v = getattr(info, attr, None)
            if v:
                return int(v)
    except Exception:
        pass
    return 64 * 2 ** 20          # conservative fallback (v7x-sized VMEM)


def _vmem_working_set(nb, tl, C, A, mm_bytes):
    """Lane-padding-aware VMEM footprint estimate for one grid step."""
    ru = _round_up
    xblk = nb * ru(C, 8) * ru(tl, 128) * 4
    x_tot = 2 * xblk                                        # double-buffered input
    weights = 2 * (ru(A, 8) * ru(C, 128) * mm_bytes         # w1x
                   + ru(A, 8) * ru(2 * C, 128) * 4          # w1ms
                   + ru(A, 8) * 128 * 4                     # aux (A,3) lane-padded
                   + ru(C, 8) * ru(A, 128) * mm_bytes       # w2
                   + ru(C, 8) * 128 * 4)                    # softmax shift (C,1) lane-padded
    scratch = nb * (4 * ru(C, 8) + ru(A, 8)) * 128 * 4      # acc1/acc2/l/mean0 + b1eff
    out = 2 * nb * 8 * ru(2 * C, 128) * 4
    temps = (4 * ru(C, 8) + 2 * ru(A, 8)) * ru(tl, 128) * 4  # live (C,TL)/(A,TL) f32 temps
    return x_tot + weights + scratch + out + temps


def _choose_tiling(N, C, L, A, mm_bytes, budget):
    """Pick (nb, tl) so the working set fits the VMEM budget.

    nb <= 2 keeps lane-padded (nb, C, 1) scratch and unrolled vreg pressure small;
    nb <= N//2 keeps >= 2 batch grid steps so megacore (v7x) can shard the batch axis.
    """
    nb_pref = 2 if (N % 2 == 0 and N >= 4) else 1
    nb_opts = (nb_pref, 1) if nb_pref > 1 else (1,)
    # Single-fetch fast path: tl == L -> identical x block index in both passes, so the
    # block stays resident and x is read from HBM exactly once.
    for nb in nb_opts:
        if _vmem_working_set(nb, L, C, A, mm_bytes) <= budget:
            return nb, L
    if L < 128:
        return 1, L
    max_tl = min(2048, (L // 128) * 128)
    for nb in nb_opts:
        tl = max_tl
        while tl >= 128:
            if _vmem_working_set(nb, tl, C, A, mm_bytes) <= budget:
                return nb, tl
            tl -= 128
    return 1, 128


def attentive_statistics_pooling(x, lengths, params, *, matmul_dtype=jnp.float32):
    """ASP forward.  x: [N, C, L] f32, lengths: [N] relative lengths in (0, 1] (or None)."""
    N, C, L = x.shape
    A = params["w1"].shape[0]
    if lengths is None:
        lengths = jnp.ones((N,), dtype=jnp.float32)
    lengths = lengths.astype(jnp.float32)

    # length_to_mask semantics: mask[t] = (t < lengths*L)  ->  count = ceil(lengths*L)
    counts = jnp.clip(jnp.ceil(lengths * L), 0, L).astype(jnp.int32)

    # ----- host-side parameter folding (done once, cheap) -----
    w1 = params["w1"].astype(jnp.float32)                  # [A, 3C]
    w1x = w1[:, :C].astype(matmul_dtype)
    w1ms = w1[:, C:]                                       # [A, 2C] (mean|std columns)
    bn_scale = params["gamma"] / jnp.sqrt(params["rv"] + BN_EPS)
    bn_shift = params["beta"] - params["rm"] * bn_scale
    aux = jnp.stack([params["b1"], bn_scale, bn_shift], axis=1).astype(jnp.float32)  # [A, 3]
    w2f = params["w2"].astype(jnp.float32)                 # [C, A]
    w2 = w2f.astype(matmul_dtype)
    # b2 folds into the softmax shift; -sum|w2| upper-bounds the logits (tanh in [-1,1]).
    # NOTE: assumes sum_a |w2[c,a]| stays well inside the f32 exp range (holds for
    # realistic trained weights).
    lshift = -jnp.sum(jnp.abs(w2f), axis=1, keepdims=True)    # [C, 1]

    mm_bytes = jnp.dtype(matmul_dtype).itemsize
    cap = _vmem_capacity_bytes()
    budget = min(int(cap * 0.85), cap - 8 * 2 ** 20)
    nb, tl = _choose_tiling(N, C, L, A, mm_bytes, budget)
    n_lt = pl.cdiv(L, tl)
    oob_guard = (L % tl) != 0

    kernel = functools.partial(_asp_kernel, total_len=L, n_lt=n_lt,
                               mm_dtype=matmul_dtype, oob_guard=oob_guard)

    def x_index(b, p, l, cnt):
        # pass 1 walks the time tiles in reverse so the boundary tile stays resident
        return (b, 0, l + p * ((n_lt - 1) - 2 * l))

    grid_spec = pltpu.PrefetchScalarGridSpec(
        num_scalar_prefetch=1,
        grid=(N // nb, 2, n_lt),
        in_specs=[
            pl.BlockSpec((nb, C, tl), x_index),                         # x
            pl.BlockSpec((A, C), lambda b, p, l, cnt: (0, 0)),          # w1_x
            pl.BlockSpec((A, 2 * C), lambda b, p, l, cnt: (0, 0)),      # w1_[mean|std]
            pl.BlockSpec((A, 3), lambda b, p, l, cnt: (0, 0)),          # (b1, bn_scale, bn_shift)
            pl.BlockSpec((C, A), lambda b, p, l, cnt: (0, 0)),          # w2
            pl.BlockSpec((C, 1), lambda b, p, l, cnt: (0, 0)),          # softmax shift
        ],
        out_specs=pl.BlockSpec((nb, 1, 2 * C), lambda b, p, l, cnt: (b, 0, 0)),
        scratch_shapes=[
            pltpu.VMEM((nb, C, 1), jnp.float32),    # acc1: sum(x) / attn-weighted first moment
            pltpu.VMEM((nb, C, 1), jnp.float32),    # acc2: sum(x^2) / attn-weighted 2nd moment
            pltpu.VMEM((nb, C, 1), jnp.float32),    # softmax denominator
            pltpu.VMEM((nb, C, 1), jnp.float32),    # pass-0 mean (centering for pass 1)
            pltpu.VMEM((nb, A, 1), jnp.float32),    # folded TDNN bias
        ],
    )

    est = _vmem_working_set(nb, tl, C, A, mm_bytes)
    vmem_limit = int(min(cap - 2 * 2 ** 20,
                         max(32 * 2 ** 20, int(est * 1.2) + 8 * 2 ** 20)))

    out = pl.pallas_call(
        kernel,
        grid_spec=grid_spec,
        out_shape=jax.ShapeDtypeStruct((N, 1, 2 * C), jnp.float32),
        compiler_params=pltpu.CompilerParams(
            dimension_semantics=("parallel", "arbitrary", "arbitrary"),
            vmem_limit_bytes=vmem_limit),
    )(counts, x.astype(jnp.float32), w1x, w1ms, aux, w2, lshift)

    return out.reshape(N, 2 * C, 1)                     # [N, 2C, 1] like the PyTorch module


def _reference(x, lengths, params):
    """Pure-JAX reference mirroring the PyTorch forward (inference-mode BN)."""
    N, C, L = x.shape
    iota = jnp.arange(L, dtype=jnp.float32)[None, :]
    mask = (iota < lengths[:, None] * L).astype(jnp.float32)[:, None, :]   # [N,1,L]
    total = jnp.sum(mask, axis=2, keepdims=True)
    w = mask / total
    mean = jnp.sum(w * x, axis=2, keepdims=True)
    std = jnp.sqrt(jnp.clip(jnp.sum(w * (x - mean) ** 2, axis=2, keepdims=True), EPS))
    attn_in = jnp.concatenate(
        [x, jnp.broadcast_to(mean, (N, C, L)), jnp.broadcast_to(std, (N, C, L))], axis=1)
    h = jnp.einsum("ac,ncl->nal", params["w1"], attn_in) + params["b1"][None, :, None]
    h = jnp.maximum(h, 0.0)
    h = ((h - params["rm"][None, :, None]) / jnp.sqrt(params["rv"][None, :, None] + BN_EPS)
         * params["gamma"][None, :, None] + params["beta"][None, :, None])
    h = jnp.tanh(h)
    a = jnp.einsum("ca,nal->ncl", params["w2"], h) + params["b2"][None, :, None]
    a = jnp.where(mask == 0.0, -jnp.inf, a)
    attn = jax.nn.softmax(a, axis=2)
    mean2 = jnp.sum(attn * x, axis=2, keepdims=True)
    std2 = jnp.sqrt(jnp.clip(jnp.sum(attn * (x - mean2) ** 2, axis=2, keepdims=True), EPS))
    return jnp.concatenate([mean2, std2], axis=1)                          # [N, 2C, 1]


if __name__ == "__main__":
    N, C, L = 2, 16, 64          # batch, channels, time
    A = 32                       # attention_channels

    key = jax.random.PRNGKey(0)
    keys = jax.random.split(key, 10)
    x = jax.random.normal(keys[0], (N, C, L), dtype=jnp.float32)
    lengths = jnp.array([1.0, 0.75], dtype=jnp.float32)

    params = {
        "w1": 0.1 * jax.random.normal(keys[1], (A, 3 * C), dtype=jnp.float32),
        "b1": 0.1 * jax.random.normal(keys[2], (A,), dtype=jnp.float32),
        "gamma": 1.0 + 0.1 * jax.random.normal(keys[3], (A,), dtype=jnp.float32),
        "beta": 0.1 * jax.random.normal(keys[4], (A,), dtype=jnp.float32),
        "rm": 0.1 * jax.random.normal(keys[5], (A,), dtype=jnp.float32),
        "rv": jax.random.uniform(keys[6], (A,), minval=0.5, maxval=1.5, dtype=jnp.float32),
        "w2": 0.1 * jax.random.normal(keys[7], (C, A), dtype=jnp.float32),
        "b2": 0.1 * jax.random.normal(keys[8], (C,), dtype=jnp.float32),
    }

    ref = _reference(x, lengths, params)

    # f32 matmul path: semantic check against the PyTorch-equivalent reference.
    out_f32 = attentive_statistics_pooling(x, lengths, params, matmul_dtype=jnp.float32)
    out_f32 = jax.block_until_ready(out_f32)
    assert out_f32.shape == (N, 2 * C, 1)
    assert jnp.allclose(out_f32, ref, atol=5e-2, rtol=5e-2), \
        f"f32 path max abs err {jnp.max(jnp.abs(out_f32 - ref))}"

    # bf16 MXU fast path (v6e/v7x): same kernel with bf16 matmul operands.
    out_bf16 = attentive_statistics_pooling(x, lengths, params, matmul_dtype=jnp.bfloat16)
    out_bf16 = jax.block_until_ready(out_bf16)
    assert out_bf16.shape == (N, 2 * C, 1)
    assert float(jnp.max(jnp.abs(out_bf16 - ref))) < 0.2, \
        f"bf16 path max abs err {jnp.max(jnp.abs(out_bf16 - ref))}"

    print("KERNEL_OK")
</pallas_src>

<mosaic_0001>
module attributes {stable_mosaic.version = 11 : i64} {
  func.func @_asp_kernel(%arg0: i32, %arg1: i32, %arg2: i32, %arg3: memref<2xi32, #tpu.memory_space<smem>>, %arg4: memref<1x16x64xf32, #tpu.memory_space<vmem>>, %arg5: memref<32x16xf32, #tpu.memory_space<vmem>>, %arg6: memref<32x32xf32, #tpu.memory_space<vmem>>, %arg7: memref<32x3xf32, #tpu.memory_space<vmem>>, %arg8: memref<16x32xf32, #tpu.memory_space<vmem>>, %arg9: memref<16x1xf32, #tpu.memory_space<vmem>>, %arg10: memref<1x1x32xf32, #tpu.memory_space<vmem>>, %arg11: memref<1x16x1xf32, #tpu.memory_space<vmem>>, %arg12: memref<1x16x1xf32, #tpu.memory_space<vmem>>, %arg13: memref<1x16x1xf32, #tpu.memory_space<vmem>>, %arg14: memref<1x16x1xf32, #tpu.memory_space<vmem>>, %arg15: memref<1x32x1xf32, #tpu.memory_space<vmem>>) attributes {dimension_semantics = [#tpu.dimension_semantics<parallel>, #tpu.dimension_semantics<arbitrary>, #tpu.dimension_semantics<arbitrary>], iteration_bounds = array<i64: 2, 2, 1>, scalar_prefetch = 1 : i64, scratch_operands = 5 : i64, tpu.core_type = #tpu.core_type<tc>, window_params = [{transform_indices = @transform_0, window_bounds = array<i64: 1, 16, 64>}, {pipeline_mode = #tpu.pipeline_mode<synchronous>, transform_indices = @transform_1, window_bounds = array<i64: 32, 16>}, {pipeline_mode = #tpu.pipeline_mode<synchronous>, transform_indices = @transform_2, window_bounds = array<i64: 32, 32>}, {pipeline_mode = #tpu.pipeline_mode<synchronous>, transform_indices = @transform_3, window_bounds = array<i64: 32, 3>}, {pipeline_mode = #tpu.pipeline_mode<synchronous>, transform_indices = @transform_4, window_bounds = array<i64: 16, 32>}, {pipeline_mode = #tpu.pipeline_mode<synchronous>, transform_indices = @transform_5, window_bounds = array<i64: 16, 1>}, {transform_indices = @transform_6, window_bounds = array<i64: 1, 1, 32>}]} {
    %c2_i32 = arith.constant 2 : i32
    %0 = arith.muli %c2_i32, %arg2 : i32
    %c0_i32 = arith.constant 0 : i32
    %1 = arith.subi %c0_i32, %0 : i32
    %2 = arith.muli %arg1, %1 : i32
    %3 = arith.addi %arg2, %2 : i32
    %c64_i32 = arith.constant 64 : i32
    %4 = arith.muli %3, %c64_i32 : i32
    %5 = tpu.iota {dimensions = array<i32: 1>} : vector<1x64xi32>
    %6 = vector.broadcast %4 : i32 to vector<1x64xi32>
    %7 = arith.addi %5, %6 : vector<1x64xi32>
    %8 = tpu.iota {dimensions = array<i32: 0>} : vector<64x1xi32>
    %9 = vector.broadcast %4 : i32 to vector<64x1xi32>
    %10 = arith.addi %8, %9 : vector<64x1xi32>
    %c1_i32 = arith.constant 1 : i32
    %11 = arith.muli %arg0, %c1_i32 : i32
    %c0_i32_0 = arith.constant 0 : i32
    %12 = arith.cmpi eq, %arg1, %c0_i32_0 : i32
    %13 = arith.extui %12 : i1 to i32
    %c0_i32_1 = arith.constant 0 : i32
    %14 = arith.cmpi ne, %13, %c0_i32_1 : i32
    scf.if %14 {
      %c0_i32_4 = arith.constant 0 : i32
      %18 = arith.cmpi eq, %arg2, %c0_i32_4 : i32
      %19 = arith.extui %18 : i1 to i32
      %c0_i32_5 = arith.constant 0 : i32
      %20 = arith.cmpi ne, %19, %c0_i32_5 : i32
      scf.if %20 {
        %cst_24 = arith.constant 0.000000e+00 : f32
        %48 = vector.broadcast %cst_24 : f32 to vector<1x16x1xf32>
        %c0_25 = arith.constant 0 : index
        %c0_26 = arith.constant 0 : index
        %c0_27 = arith.constant 0 : index
        %49 = vector.load %arg11[%c0_25, %c0_26, %c0_27] : memref<1x16x1xf32, #tpu.memory_space<vmem>>, vector<1x16x1xf32>
        tpu.vector_store %arg11[%c0_25, %c0_26, %c0_27], %48 {strides = array<i32>} : memref<1x16x1xf32, #tpu.memory_space<vmem>>, vector<1x16x1xf32>,
        %cst_28 = arith.constant 0.000000e+00 : f32
        %50 = vector.broadcast %cst_28 : f32 to vector<1x16x1xf32>
        %c0_29 = arith.constant 0 : index
        %c0_30 = arith.constant 0 : index
        %c0_31 = arith.constant 0 : index
        %51 = vector.load %arg12[%c0_29, %c0_30, %c0_31] : memref<1x16x1xf32, #tpu.memory_space<vmem>>, vector<1x16x1xf32>
        tpu.vector_store %arg12[%c0_29, %c0_30, %c0_31], %50 {strides = array<i32>} : memref<1x16x1xf32, #tpu.memory_space<vmem>>, vector<1x16x1xf32>,
      } else {
      }
      %c0_i32_6 = arith.constant 0 : i32
      %21 = arith.addi %11, %c0_i32_6 : i32
      %22 = arith.index_cast %21 : i32 to index
      %23 = memref.load %arg3[%22] : memref<2xi32, #tpu.memory_space<smem>>
      %24 = vector.broadcast %23 : i32 to vector<64x1xi32>
      %25 = arith.cmpi slt, %10, %24 : vector<64x1xi32>
      %26 = arith.extui %25 : vector<64x1xi1> to vector<64x1xi32>
      %27 = arith.sitofp %26 : vector<64x1xi32> to vector<64x1xf32>
      %c0 = arith.constant 0 : index
      %c0_7 = arith.constant 0 : index
      %c0_8 = arith.constant 0 : index
      %28 = vector.load %arg4[%c0, %c0_7, %c0_8] : memref<1x16x64xf32, #tpu.memory_space<vmem>>, vector<1x16x64xf32>
      %29 = vector.shape_cast %28 : vector<1x16x64xf32> to vector<16x64xf32>
      %c0_9 = arith.constant 0 : index
      %c0_10 = arith.constant 0 : index
      %c0_11 = arith.constant 0 : index
      %30 = vector.load %arg11[%c0_9, %c0_10, %c0_11] : memref<1x16x1xf32, #tpu.memory_space<vmem>>, vector<1x16x1xf32>
      %31 = vector.shape_cast %30 : vector<1x16x1xf32> to vector<16x1xf32>
      %cst = arith.constant dense<0.000000e+00> : vector<16x1xf32>
      %32 = tpu.matmul %29, %27, %cst {dimension_numbers = #tpu.dot_dimension_numbers<[1], [0], [0], [1], [0, 0, 1, 1], [], []>} : vector<16x64xf32>, vector<64x1xf32>, vector<16x1xf32> -> vector<16x1xf32>
      %33 = arith.addf %31, %32 : vector<16x1xf32>
      %c0_12 = arith.constant 0 : index
      %c0_13 = arith.constant 0 : index
      %c0_14 = arith.constant 0 : index
      %34 = vector.load %arg11[%c0_12, %c0_13, %c0_14] : memref<1x16x1xf32, #tpu.memory_space<vmem>>, vector<1x16x1xf32>
      %35 = vector.shape_cast %34 : vector<1x16x1xf32> to vector<16x1xf32>
      %36 = vector.shape_cast %33 : vector<16x1xf32> to vector<1x16x1xf32>
      tpu.vector_store %arg11[%c0_12, %c0_13, %c0_14], %36 {strides = array<i32>} : memref<1x16x1xf32, #tpu.memory_space<vmem>>, vector<1x16x1xf32>,
      %c0_15 = arith.constant 0 : index
      %c0_16 = arith.constant 0 : index
      %c0_17 = arith.constant 0 : index
      %37 = vector.load %arg12[%c0_15, %c0_16, %c0_17] : memref<1x16x1xf32, #tpu.memory_space<vmem>>, vector<1x16x1xf32>
      %38 = vector.shape_cast %37 : vector<1x16x1xf32> to vector<16x1xf32>
      %39 = arith.mulf %29, %29 : vector<16x64xf32>
      %cst_18 = arith.constant dense<0.000000e+00> : vector<16x1xf32>
      %40 = tpu.matmul %39, %27, %cst_18 {dimension_numbers = #tpu.dot_dimension_numbers<[1], [0], [0], [1], [0, 0, 1, 1], [], []>} : vector<16x64xf32>, vector<64x1xf32>, vector<16x1xf32> -> vector<16x1xf32>
      %41 = arith.addf %38, %40 : vector<16x1xf32>
      %c0_19 = arith.constant 0 : index
      %c0_20 = arith.constant 0 : index
      %c0_21 = arith.constant 0 : index
      %42 = vector.load %arg12[%c0_19, %c0_20, %c0_21] : memref<1x16x1xf32, #tpu.memory_space<vmem>>, vector<1x16x1xf32>
      %43 = vector.shape_cast %42 : vector<1x16x1xf32> to vector<16x1xf32>
      %44 = vector.shape_cast %41 : vector<16x1xf32> to vector<1x16x1xf32>
      tpu.vector_store %arg12[%c0_19, %c0_20, %c0_21], %44 {strides = array<i32>} : memref<1x16x1xf32, #tpu.memory_space<vmem>>, vector<1x16x1xf32>,
      %c0_i32_22 = arith.constant 0 : i32
      %45 = arith.cmpi eq, %arg2, %c0_i32_22 : i32
      %46 = arith.extui %45 : i1 to i32
      %c0_i32_23 = arith.constant 0 : i32
      %47 = arith.cmpi ne, %46, %c0_i32_23 : i32
      scf.if %47 {
        %c0_i32_24 = arith.constant 0 : i32
        %48 = arith.addi %11, %c0_i32_24 : i32
        %49 = arith.index_cast %48 : i32 to index
        %50 = memref.load %arg3[%49] : memref<2xi32, #tpu.memory_space<smem>>
        %51 = arith.sitofp %50 : i32 to f32
        %cst_25 = arith.constant 1.000000e+00 : f32
        %52 = arith.maximumf %51, %cst_25 : f32
        %c0_26 = arith.constant 0 : index
        %c0_27 = arith.constant 0 : index
        %c0_28 = arith.constant 0 : index
        %53 = vector.load %arg11[%c0_26, %c0_27, %c0_28] : memref<1x16x1xf32, #tpu.memory_space<vmem>>, vector<1x16x1xf32>
        %54 = vector.shape_cast %53 : vector<1x16x1xf32> to vector<16x1xf32>
        %55 = vector.broadcast %52 : f32 to vector<16x1xf32>
        %56 = arith.divf %54, %55 : vector<16x1xf32>
        %c0_29 = arith.constant 0 : index
        %c0_30 = arith.constant 0 : index
        %c0_31 = arith.constant 0 : index
        %57 = vector.load %arg12[%c0_29, %c0_30, %c0_31] : memref<1x16x1xf32, #tpu.memory_space<vmem>>, vector<1x16x1xf32>
        %58 = vector.shape_cast %57 : vector<1x16x1xf32> to vector<16x1xf32>
        %59 = vector.broadcast %52 : f32 to vector<16x1xf32>
        %60 = arith.divf %58, %59 : vector<16x1xf32>
        %61 = arith.mulf %56, %56 : vector<16x1xf32>
        %62 = arith.subf %60, %61 : vector<16x1xf32>
        %cst_32 = arith.constant 9.99999996E-13 : f32
        %63 = vector.broadcast %cst_32 : f32 to vector<16x1xf32>
        %64 = arith.maximumf %62, %63 : vector<16x1xf32>
        %65 = math.sqrt %64 : vector<16x1xf32>
        %66 = tpu.concatenate %56, %65 in 0 : vector<16x1xf32>, vector<16x1xf32> -> vector<32x1xf32>
        %c0_33 = arith.constant 0 : index
        %c0_34 = arith.constant 0 : index
        %67 = vector.load %arg7[%c0_33, %c0_34] : memref<32x3xf32, #tpu.memory_space<vmem>>, vector<32x1xf32>
        %c0_35 = arith.constant 0 : index
        %c0_36 = arith.constant 0 : index
        %68 = vector.load %arg6[%c0_35, %c0_36] : memref<32x32xf32, #tpu.memory_space<vmem>>, vector<32x32xf32>
        %cst_37 = arith.constant dense<0.000000e+00> : vector<32x1xf32>
        %69 = tpu.matmul %68, %66, %cst_37 {dimension_numbers = #tpu.dot_dimension_numbers<[1], [0], [0], [1], [0, 0, 1, 1], [], []>} : vector<32x32xf32>, vector<32x1xf32>, vector<32x1xf32> -> vector<32x1xf32>
        %70 = arith.addf %67, %69 : vector<32x1xf32>
        %c0_38 = arith.constant 0 : index
        %c0_39 = arith.constant 0 : index
        %c0_40 = arith.constant 0 : index
        %71 = vector.load %arg15[%c0_38, %c0_39, %c0_40] : memref<1x32x1xf32, #tpu.memory_space<vmem>>, vector<1x32x1xf32>
        %72 = vector.shape_cast %71 : vector<1x32x1xf32> to vector<32x1xf32>
        %73 = vector.shape_cast %70 : vector<32x1xf32> to vector<1x32x1xf32>
        tpu.vector_store %arg15[%c0_38, %c0_39, %c0_40], %73 {strides = array<i32>} : memref<1x32x1xf32, #tpu.memory_space<vmem>>, vector<1x32x1xf32>,
        %c0_41 = arith.constant 0 : index
        %c0_42 = arith.constant 0 : index
        %c0_43 = arith.constant 0 : index
        %74 = vector.load %arg14[%c0_41, %c0_42, %c0_43] : memref<1x16x1xf32, #tpu.memory_space<vmem>>, vector<1x16x1xf32>
        %75 = vector.shape_cast %74 : vector<1x16x1xf32> to vector<16x1xf32>
        %76 = vector.shape_cast %56 : vector<16x1xf32> to vector<1x16x1xf32>
        tpu.vector_store %arg14[%c0_41, %c0_42, %c0_43], %76 {strides = array<i32>} : memref<1x16x1xf32, #tpu.memory_space<vmem>>, vector<1x16x1xf32>,
        %cst_44 = arith.constant 0.000000e+00 : f32
        %77 = vector.broadcast %cst_44 : f32 to vector<16x1xf32>
        %c0_45 = arith.constant 0 : index
        %c0_46 = arith.constant 0 : index
        %c0_47 = arith.constant 0 : index
        %78 = vector.load %arg11[%c0_45, %c0_46, %c0_47] : memref<1x16x1xf32, #tpu.memory_space<vmem>>, vector<1x16x1xf32>
        %79 = vector.shape_cast %78 : vector<1x16x1xf32> to vector<16x1xf32>
        %80 = vector.shape_cast %77 : vector<16x1xf32> to vector<1x16x1xf32>
        tpu.vector_store %arg11[%c0_45, %c0_46, %c0_47], %80 {strides = array<i32>} : memref<1x16x1xf32, #tpu.memory_space<vmem>>, vector<1x16x1xf32>,
        %cst_48 = arith.constant 0.000000e+00 : f32
        %81 = vector.broadcast %cst_48 : f32 to vector<16x1xf32>
        %c0_49 = arith.constant 0 : index
        %c0_50 = arith.constant 0 : index
        %c0_51 = arith.constant 0 : index
        %82 = vector.load %arg12[%c0_49, %c0_50, %c0_51] : memref<1x16x1xf32, #tpu.memory_space<vmem>>, vector<1x16x1xf32>
        %83 = vector.shape_cast %82 : vector<1x16x1xf32> to vector<16x1xf32>
        %84 = vector.shape_cast %81 : vector<16x1xf32> to vector<1x16x1xf32>
        tpu.vector_store %arg12[%c0_49, %c0_50, %c0_51], %84 {strides = array<i32>} : memref<1x16x1xf32, #tpu.memory_space<vmem>>, vector<1x16x1xf32>,
        %cst_52 = arith.constant 0.000000e+00 : f32
        %85 = vector.broadcast %cst_52 : f32 to vector<16x1xf32>
        %c0_53 = arith.constant 0 : index
        %c0_54 = arith.constant 0 : index
        %c0_55 = arith.constant 0 : index
        %86 = vector.load %arg13[%c0_53, %c0_54, %c0_55] : memref<1x16x1xf32, #tpu.memory_space<vmem>>, vector<1x16x1xf32>
        %87 = vector.shape_cast %86 : vector<1x16x1xf32> to vector<16x1xf32>
        %88 = vector.shape_cast %85 : vector<16x1xf32> to vector<1x16x1xf32>
        tpu.vector_store %arg13[%c0_53, %c0_54, %c0_55], %88 {strides = array<i32>} : memref<1x16x1xf32, #tpu.memory_space<vmem>>, vector<1x16x1xf32>,
      } else {
      }
    } else {
    }
    %c1_i32_2 = arith.constant 1 : i32
    %15 = arith.cmpi eq, %arg1, %c1_i32_2 : i32
    %16 = arith.extui %15 : i1 to i32
    %c0_i32_3 = arith.constant 0 : i32
    %17 = arith.cmpi ne, %16, %c0_i32_3 : i32
    scf.if %17 {
      %c0 = arith.constant 0 : index
      %c1 = arith.constant 1 : index
      %18 = vector.load %arg7[%c0, %c1] : memref<32x3xf32, #tpu.memory_space<vmem>>, vector<32x1xf32>
      %c0_4 = arith.constant 0 : index
      %c2 = arith.constant 2 : index
      %19 = vector.load %arg7[%c0_4, %c2] : memref<32x3xf32, #tpu.memory_space<vmem>>, vector<32x1xf32>
      %c0_i32_5 = arith.constant 0 : i32
      %20 = arith.addi %11, %c0_i32_5 : i32
      %21 = arith.index_cast %20 : i32 to index
      %22 = memref.load %arg3[%21] : memref<2xi32, #tpu.memory_space<smem>>
      %23 = vector.broadcast %22 : i32 to vector<1x64xi32>
      %24 = arith.cmpi slt, %7, %23 : vector<1x64xi32>
      %25 = arith.extui %24 : vector<1x64xi1> to vector<1x64xi32>
      %26 = arith.sitofp %25 : vector<1x64xi32> to vector<1x64xf32>
      %c0_6 = arith.constant 0 : index
      %c0_7 = arith.constant 0 : index
      %c0_8 = arith.constant 0 : index
      %27 = vector.load %arg4[%c0_6, %c0_7, %c0_8] : memref<1x16x64xf32, #tpu.memory_space<vmem>>, vector<1x16x64xf32>
      %28 = vector.shape_cast %27 : vector<1x16x64xf32> to vector<16x64xf32>
      %c0_9 = arith.constant 0 : index
      %c0_10 = arith.constant 0 : index
      %29 = vector.load %arg5[%c0_9, %c0_10] : memref<32x16xf32, #tpu.memory_space<vmem>>, vector<32x16xf32>
      %cst = arith.constant dense<0.000000e+00> : vector<32x64xf32>
      %30 = tpu.matmul %29, %28, %cst {dimension_numbers = #tpu.dot_dimension_numbers<[1], [0], [0], [1], [0, 0, 1, 1], [], []>} : vector<32x16xf32>, vector<16x64xf32>, vector<32x64xf32> -> vector<32x64xf32>
      %c0_11 = arith.constant 0 : index
      %c0_12 = arith.constant 0 : index
      %c0_13 = arith.constant 0 : index
      %31 = vector.load %arg15[%c0_11, %c0_12, %c0_13] : memref<1x32x1xf32, #tpu.memory_space<vmem>>, vector<1x32x1xf32>
      %32 = vector.shape_cast %31 : vector<1x32x1xf32> to vector<32x1xf32>
      %33 = vector.broadcast %32 : vector<32x1xf32> to vector<32x64xf32>
      %34 = arith.addf %30, %33 : vector<32x64xf32>
      %cst_14 = arith.constant 0.000000e+00 : f32
      %35 = vector.broadcast %cst_14 : f32 to vector<32x64xf32>
      %36 = arith.maximumf %34, %35 : vector<32x64xf32>
      %37 = vector.broadcast %18 : vector<32x1xf32> to vector<32x64xf32>
      %38 = arith.mulf %36, %37 : vector<32x64xf32>
      %39 = vector.broadcast %19 : vector<32x1xf32> to vector<32x64xf32>
      %40 = arith.addf %38, %39 : vector<32x64xf32>
      %41 = math.tanh %40 : vector<32x64xf32>
      %c0_15 = arith.constant 0 : index
      %c0_16 = arith.constant 0 : index
      %42 = vector.load %arg8[%c0_15, %c0_16] : memref<16x32xf32, #tpu.memory_space<vmem>>, vector<16x32xf32>
      %cst_17 = arith.constant dense<0.000000e+00> : vector<16x64xf32>
      %43 = tpu.matmul %42, %41, %cst_17 {dimension_numbers = #tpu.dot_dimension_numbers<[1], [0], [0], [1], [0, 0, 1, 1], [], []>} : vector<16x32xf32>, vector<32x64xf32>, vector<16x64xf32> -> vector<16x64xf32>
      %c0_18 = arith.constant 0 : index
      %c0_19 = arith.constant 0 : index
      %44 = vector.load %arg9[%c0_18, %c0_19] : memref<16x1xf32, #tpu.memory_space<vmem>>, vector<16x1xf32>
      %45 = vector.broadcast %44 : vector<16x1xf32> to vector<16x64xf32>
      %46 = arith.addf %43, %45 : vector<16x64xf32>
      %47 = math.exp %46 : vector<16x64xf32>
      %48 = vector.broadcast %26 : vector<1x64xf32> to vector<16x64xf32>
      %49 = arith.mulf %47, %48 : vector<16x64xf32>
      %c0_20 = arith.constant 0 : index
      %c0_21 = arith.constant 0 : index
      %c0_22 = arith.constant 0 : index
      %50 = vector.load %arg14[%c0_20, %c0_21, %c0_22] : memref<1x16x1xf32, #tpu.memory_space<vmem>>, vector<1x16x1xf32>
      %51 = vector.shape_cast %50 : vector<1x16x1xf32> to vector<16x1xf32>
      %52 = vector.broadcast %51 : vector<16x1xf32> to vector<16x64xf32>
      %53 = arith.subf %28, %52 : vector<16x64xf32>
      %54 = arith.mulf %49, %53 : vector<16x64xf32>
      %c0_23 = arith.constant 0 : index
      %c0_24 = arith.constant 0 : index
      %c0_25 = arith.constant 0 : index
      %55 = vector.load %arg13[%c0_23, %c0_24, %c0_25] : memref<1x16x1xf32, #tpu.memory_space<vmem>>, vector<1x16x1xf32>
      %56 = vector.shape_cast %55 : vector<1x16x1xf32> to vector<16x1xf32>
      %cst_26 = arith.constant dense<0.000000e+00> : vector<16xf32>
      %57 = vector.multi_reduction <add>, %49, %cst_26 [1] : vector<16x64xf32> to vector<16xf32>
      %58 = vector.shape_cast %57 : vector<16xf32> to vector<16x1xf32>
      %59 = arith.addf %56, %58 : vector<16x1xf32>
      %c0_27 = arith.constant 0 : index
      %c0_28 = arith.constant 0 : index
      %c0_29 = arith.constant 0 : index
      %60 = vector.load %arg13[%c0_27, %c0_28, %c0_29] : memref<1x16x1xf32, #tpu.memory_space<vmem>>, vector<1x16x1xf32>
      %61 = vector.shape_cast %60 : vector<1x16x1xf32> to vector<16x1xf32>
      %62 = vector.shape_cast %59 : vector<16x1xf32> to vector<1x16x1xf32>
      tpu.vector_store %arg13[%c0_27, %c0_28, %c0_29], %62 {strides = array<i32>} : memref<1x16x1xf32, #tpu.memory_space<vmem>>, vector<1x16x1xf32>,
      %c0_30 = arith.constant 0 : index
      %c0_31 = arith.constant 0 : index
      %c0_32 = arith.constant 0 : index
      %63 = vector.load %arg11[%c0_30, %c0_31, %c0_32] : memref<1x16x1xf32, #tpu.memory_space<vmem>>, vector<1x16x1xf32>
      %64 = vector.shape_cast %63 : vector<1x16x1xf32> to vector<16x1xf32>
      %cst_33 = arith.constant dense<0.000000e+00> : vector<16xf32>
      %65 = vector.multi_reduction <add>, %54, %cst_33 [1] : vector<16x64xf32> to vector<16xf32>
      %66 = vector.shape_cast %65 : vector<16xf32> to vector<16x1xf32>
      %67 = arith.addf %64, %66 : vector<16x1xf32>
      %c0_34 = arith.constant 0 : index
      %c0_35 = arith.constant 0 : index
      %c0_36 = arith.constant 0 : index
      %68 = vector.load %arg11[%c0_34, %c0_35, %c0_36] : memref<1x16x1xf32, #tpu.memory_space<vmem>>, vector<1x16x1xf32>
      %69 = vector.shape_cast %68 : vector<1x16x1xf32> to vector<16x1xf32>
      %70 = vector.shape_cast %67 : vector<16x1xf32> to vector<1x16x1xf32>
      tpu.vector_store %arg11[%c0_34, %c0_35, %c0_36], %70 {strides = array<i32>} : memref<1x16x1xf32, #tpu.memory_space<vmem>>, vector<1x16x1xf32>,
      %c0_37 = arith.constant 0 : index
      %c0_38 = arith.constant 0 : index
      %c0_39 = arith.constant 0 : index
      %71 = vector.load %arg12[%c0_37, %c0_38, %c0_39] : memref<1x16x1xf32, #tpu.memory_space<vmem>>, vector<1x16x1xf32>
      %72 = vector.shape_cast %71 : vector<1x16x1xf32> to vector<16x1xf32>
      %73 = arith.mulf %54, %53 : vector<16x64xf32>
      %cst_40 = arith.constant dense<0.000000e+00> : vector<16xf32>
      %74 = vector.multi_reduction <add>, %73, %cst_40 [1] : vector<16x64xf32> to vector<16xf32>
      %75 = vector.shape_cast %74 : vector<16xf32> to vector<16x1xf32>
      %76 = arith.addf %72, %75 : vector<16x1xf32>
      %c0_41 = arith.constant 0 : index
      %c0_42 = arith.constant 0 : index
      %c0_43 = arith.constant 0 : index
      %77 = vector.load %arg12[%c0_41, %c0_42, %c0_43] : memref<1x16x1xf32, #tpu.memory_space<vmem>>, vector<1x16x1xf32>
      %78 = vector.shape_cast %77 : vector<1x16x1xf32> to vector<16x1xf32>
      %79 = vector.shape_cast %76 : vector<16x1xf32> to vector<1x16x1xf32>
      tpu.vector_store %arg12[%c0_41, %c0_42, %c0_43], %79 {strides = array<i32>} : memref<1x16x1xf32, #tpu.memory_space<vmem>>, vector<1x16x1xf32>,
      %c0_i32_44 = arith.constant 0 : i32
      %80 = arith.cmpi eq, %arg2, %c0_i32_44 : i32
      %81 = arith.extui %80 : i1 to i32
      %c0_i32_45 = arith.constant 0 : i32
      %82 = arith.cmpi ne, %81, %c0_i32_45 : i32
      scf.if %82 {
        %c0_46 = arith.constant 0 : index
        %c0_47 = arith.constant 0 : index
        %c0_48 = arith.constant 0 : index
        %83 = vector.load %arg13[%c0_46, %c0_47, %c0_48] : memref<1x16x1xf32, #tpu.memory_space<vmem>>, vector<1x16x1xf32>
        %84 = vector.shape_cast %83 : vector<1x16x1xf32> to vector<16x1xf32>
        %cst_49 = arith.constant 1.000000e+00 : f32
        %85 = vector.broadcast %cst_49 : f32 to vector<16x1xf32>
        %86 = arith.divf %85, %84 : vector<16x1xf32>
        %c0_50 = arith.constant 0 : index
        %c0_51 = arith.constant 0 : index
        %c0_52 = arith.constant 0 : index
        %87 = vector.load %arg11[%c0_50, %c0_51, %c0_52] : memref<1x16x1xf32, #tpu.memory_space<vmem>>, vector<1x16x1xf32>
        %88 = vector.shape_cast %87 : vector<1x16x1xf32> to vector<16x1xf32>
        %89 = arith.mulf %88, %86 : vector<16x1xf32>
        %c0_53 = arith.constant 0 : index
        %c0_54 = arith.constant 0 : index
        %c0_55 = arith.constant 0 : index
        %90 = vector.load %arg14[%c0_53, %c0_54, %c0_55] : memref<1x16x1xf32, #tpu.memory_space<vmem>>, vector<1x16x1xf32>
        %91 = vector.shape_cast %90 : vector<1x16x1xf32> to vector<16x1xf32>
        %92 = arith.addf %91, %89 : vector<16x1xf32>
        %c0_56 = arith.constant 0 : index
        %c0_57 = arith.constant 0 : index
        %c0_58 = arith.constant 0 : index
        %93 = vector.load %arg12[%c0_56, %c0_57, %c0_58] : memref<1x16x1xf32, #tpu.memory_space<vmem>>, vector<1x16x1xf32>
        %94 = vector.shape_cast %93 : vector<1x16x1xf32> to vector<16x1xf32>
        %95 = arith.mulf %94, %86 : vector<16x1xf32>
        %96 = arith.mulf %89, %89 : vector<16x1xf32>
        %97 = arith.subf %95, %96 : vector<16x1xf32>
        %cst_59 = arith.constant 9.99999996E-13 : f32
        %98 = vector.broadcast %cst_59 : f32 to vector<16x1xf32>
        %99 = arith.maximumf %97, %98 : vector<16x1xf32>
        %100 = math.sqrt %99 : vector<16x1xf32>
        %101 = tpu.concatenate %92, %100 in 0 : vector<16x1xf32>, vector<16x1xf32> -> vector<32x1xf32>
        %102 = vector.shape_cast %101 : vector<32x1xf32> to vector<1x32xf32>
        %c0_60 = arith.constant 0 : index
        %c0_61 = arith.constant 0 : index
        %c0_62 = arith.constant 0 : index
        %103 = vector.load %arg10[%c0_60, %c0_61, %c0_62] : memref<1x1x32xf32, #tpu.memory_space<vmem>>, vector<1x1x32xf32>
        %104 = vector.shape_cast %103 : vector<1x1x32xf32> to vector<1x32xf32>
        %105 = vector.shape_cast %102 : vector<1x32xf32> to vector<1x1x32xf32>
        tpu.vector_store %arg10[%c0_60, %c0_61, %c0_62], %105 {strides = array<i32>} : memref<1x1x32xf32, #tpu.memory_space<vmem>>, vector<1x1x32xf32>,
      } else {
      }
    } else {
    }
    return
  }
  func.func @transform_0(%arg0: i32, %arg1: i32, %arg2: i32, %arg3: memref<2xi32, #tpu.memory_space<smem>>) -> (i32, i32, i32) {
    %c2_i32 = arith.constant 2 : i32
    %0 = arith.muli %c2_i32, %arg2 : i32
    %c0_i32 = arith.constant 0 : i32
    %1 = arith.subi %c0_i32, %0 : i32
    %2 = arith.muli %arg1, %1 : i32
    %3 = arith.addi %arg2, %2 : i32
    %c0_i32_0 = arith.constant 0 : i32
    %c0_i32_1 = arith.constant 0 : i32
    return %arg0, %c0_i32_0, %3 : i32, i32, i32
  }
  func.func @transform_1(%arg0: i32, %arg1: i32, %arg2: i32, %arg3: memref<2xi32, #tpu.memory_space<smem>>) -> (i32, i32) {
    %c0_i32 = arith.constant 0 : i32
    %c0_i32_0 = arith.constant 0 : i32
    %c0_i32_1 = arith.constant 0 : i32
    return %c0_i32, %c0_i32_0 : i32, i32
  }
  func.func @transform_2(%arg0: i32, %arg1: i32, %arg2: i32, %arg3: memref<2xi32, #tpu.memory_space<smem>>) -> (i32, i32) {
    %c0_i32 = arith.constant 0 : i32
    %c0_i32_0 = arith.constant 0 : i32
    %c0_i32_1 = arith.constant 0 : i32
    return %c0_i32, %c0_i32_0 : i32, i32
  }
  func.func @transform_3(%arg0: i32, %arg1: i32, %arg2: i32, %arg3: memref<2xi32, #tpu.memory_space<smem>>) -> (i32, i32) {
    %c0_i32 = arith.constant 0 : i32
    %c0_i32_0 = arith.constant 0 : i32
    %c0_i32_1 = arith.constant 0 : i32
    return %c0_i32, %c0_i32_0 : i32, i32
  }
  func.func @transform_4(%arg0: i32, %arg1: i32, %arg2: i32, %arg3: memref<2xi32, #tpu.memory_space<smem>>) -> (i32, i32) {
    %c0_i32 = arith.constant 0 : i32
    %c0_i32_0 = arith.constant 0 : i32
    %c0_i32_1 = arith.constant 0 : i32
    return %c0_i32, %c0_i32_0 : i32, i32
  }
  func.func @transform_5(%arg0: i32, %arg1: i32, %arg2: i32, %arg3: memref<2xi32, #tpu.memory_space<smem>>) -> (i32, i32) {
    %c0_i32 = arith.constant 0 : i32
    %c0_i32_0 = arith.constant 0 : i32
    %c0_i32_1 = arith.constant 0 : i32
    return %c0_i32, %c0_i32_0 : i32, i32
  }
  func.func @transform_6(%arg0: i32, %arg1: i32, %arg2: i32, %arg3: memref<2xi32, #tpu.memory_space<smem>>) -> (i32, i32, i32) {
    %c0_i32 = arith.constant 0 : i32
    %c0_i32_0 = arith.constant 0 : i32
    %c0_i32_1 = arith.constant 0 : i32
    return %arg0, %c0_i32, %c0_i32_0 : i32, i32, i32
  }
}

</mosaic_0001>

<bundles_post_ra>
// kernel: tpu_custom_call.1
= control target key start
LH: loop header
LB: loop body
LE: loop exit
PB: predicated region body
PF: predicated region fallthrough
CT: control target
= control target key end

     0   :  { %s1984_s0 = inlined_call_operand.vmem [shape: s32[2], index: 0, kind: input, shape index: {}]   ;;  %s1985_s1 = inlined_call_operand.vmem [shape: f32[2,16,64], index: 1, kind: input, shape index: {}]   ;;  %s1986_s2 = inlined_call_operand.vmem [shape: f32[32,16], index: 2, kind: input, shape index: {}]   ;;  %s1987_s3 = inlined_call_operand.vmem [shape: f32[32,32], index: 3, kind: input, shape index: {}]   ;;  %s1988_s4 = inlined_call_operand.vmem [shape: f32[32,3], index: 4, kind: input, shape index: {}]   ;;  %s1989_s5 = inlined_call_operand.vmem [shape: f32[16,32], index: 5, kind: input, shape index: {}]   ;;  %s1990_s6 = inlined_call_operand.vmem [shape: f32[16,1], index: 6, kind: input, shape index: {}]   ;;  %s1991_s7 = inlined_call_operand.hbm [shape: f32[2,1,32], index: 7, kind: output, shape index: {}]  }
   0x1   :  { %s12_s26 = sshll.u32 %s1984_s0, 4  ;;  %s13_s26 = int_to_ptr.vmem [resolvable:$true] %s12_s26 }
   0x2   :  { %s1528_s27 = scalar_lea.vmem %s13_s26, 16  ;;  %p1533_p1 = scmp.lt.s32.totalorder %s13_s26, %s13_s26 }
   0x3   :  { %p1529_p0 = scmp.ne.s32.totalorder %s13_s26, %s1528_s27  ;;  %p1534_p2 = scmp.lt.s32.totalorder %s1528_s27, %s1528_s27 }
   0x5   :  { %p1535_p3 = por %p1534_p2, %p1533_p1 }
   0x7   :  { %p1536_p4 = pnand %p1535_p3, %p1529_p0 }
   0x9   :  { %1539 = shalt.err (!%p1536_p4)  }
   0xa   :  { %s1636_s28 = smov [#allocation8]  }
   0xb   :  { %15 = dma.vmem_to_smem %s13_s26, 16, %s1636_s28, [#allocation7] }
   0xc   :  { %1598 = dma.done.wait [#allocation7], 16 }
   0xd   :  { %1599 = vsyncadd [#allocation7], 4294967280 }
   0xe   :  { %17 = sfence }
   0xf   :  { %18 = vsyncpa [#allocation10], 0 }
  0x10   :  { %20 = vsyncpa [#allocation10 + $0x1], 0  ;;  %s1688_s29 = smov 0   ;;  %s1690_s30 = smov 0  }
  0x11   :  { %s1692_s0 = smov 0   ;;  %s1694_s8 = smov 0  }
  0x12   :  { %s1696_s9 = smov 0   ;;  %s1698_s10 = smov 0  }
  0x13   :  { %s1700_s11 = smov 0   ;;  %s1702_s12 = smov 0  }
  0x14 LB: > { %s1242_s13 = sadd.s32 4294967295, %s1634_s12   ;;  %s1243_s14 = sadd.s32 4294967294, %s1634_s12   ;;  %s1634_s12 = sphi %s1702_s12, %s26_s12   ;;  %s1630_s11 = sphi %s1700_s11, %s2000_s11   ;;  %s1626_s10 = sphi %s1698_s10, %s1999_s10   ;;  %s1622_s9 = sphi %s1696_s9, %s1998_s9   ;;  %s1618_s8 = sphi %s1694_s8, %s1997_s8   ;;  %s1614_s0 = sphi %s1692_s0, %s1996_s0   ;;  %s1610_s30 = sphi %s1690_s30, %s1995_s30   ;;  %s1606_s29 = sphi %s1688_s29, %s1994_s29  }
  0x15   : > { %s41_s15 = sadd.s32 1, %s1626_s10  ;;  %s45_s16 = sadd.s32 1, %s1630_s11 }
  0x16   : > { %p43_p5 = scmp.ge.s32.totalorder %s41_s15, 2  ;;  %p203_p6 = scmp.ne.s32.totalorder %s1614_s0, %s1610_s30 }
  0x17   : > { %p204_p7 = scmp.eq.s32.totalorder %s1242_s13, 3  ;;  %p209_p9 = scmp.ne.s32.totalorder %s1610_s30, %s1606_s29 }
  0x18   : > { %s2002_s15 = smov (%p43_p5, %s41_s15), 0  ;;  %s2004_s16 = smov (!%p43_p5, %s45_s16), %s1630_s11 }
  0x19   : > { %p1737_p8 = por %p204_p7, %p203_p6  ;;  %p47_p10 = scmp.ge.s32.totalorder %s2004_s16, 2 }
  0x1a   : > { %p210_p11 = scmp.eq.s32.totalorder %s1243_s14, 3  ;;  %p1246_p12 = scmp.ge.s32.totalorder %s1634_s12, 1 }
  0x1b   : > { %p262_p13 = scmp.lt.s32.totalorder %s1634_s12, 5  ;;  %s2006_s16 = smov (%p47_p10, %s2004_s16), 0 }
  0x1c   : > { %p1747_p0 = por %p210_p11, %p209_p9  ;;  %s190_s19 = ssub.s32 %s1630_s11, %s2006_s16 }
  0x1d   : > { %p263_p1 = pnand %p1246_p12, %p262_p13  ;;  %s193_s20 = sadd.s32 1, %s1614_s0 }
  0x1e   : > { %p191_p2 = scmp.eq.s32.totalorder %s190_s19, 0  ;;  %s296_s22 = sand.u32 (!%p263_p1), 1, %s1610_s30  }
  0x1f   : > { %266 = sbr.rel (%p263_p1) target bundleno = 1291 (0x50b), region = 44  ;;  %p302_p3 = scmp.lt.s32.totalorder (!%p263_p1), %s1622_s9, 1 }
  0x20   : > { %s1755_s21 = scalar_select %p191_p2, %s1614_s0, %s193_s20  }
  0x21   : > { %s1780_s28 = scalar_lea.vmem (!%p263_p1), [#allocation9], %s296_s22  ;;  %p1249_p4 = scmp.ne.s32.totalorder (!%p263_p1), %s1618_s8, 0 }
  0x24   : > { %v319_v0 = vlaneseq  ;;  %s303_s23 = scalar_select %p302_p3, %s1622_s9, 1 }
  0x25   : > { %343 = sbr.rel (%p1249_p4) target bundleno = 496 (0x1f0), region = 48  ;;  %s353_s13 = sld [smem:[#allocation8 + %s1622_s9]] (!%p1249_p4) }
  0x26   : > { %v1760_v1 = vand.u32 127, %v319_v0  ;;  %v1762_v2 = vshrl.u32 %v319_v0, 7  ;;  %s1293_s24 = sshll.u32 %s303_s23, 4  ;;  %s1639_s26 = smov (!%p1249_p4), 1.0  }
  0x27   : > { %s1773_s27 = scalar_lea.vmem %s1985_s1, %s1293_s24  ;;  %s562_s24 = sld [smem:[#allocation8 + %s1622_s9]] (!%p1249_p4) }
  0x28   : > { %v1765_v3 = vadd.s32 8, %v1762_v2  ;;  %v326_v4 = vadd.s32 16, %v1762_v2  ;;  %v327_v5 = vadd.s32 24, %v1762_v2  ;;  %v328_v6 = vadd.s32 32, %v1762_v2 }
  0x29   : > { %v329_v7 = vadd.s32 40, %v1762_v2  ;;  %v330_v8 = vadd.s32 48, %v1762_v2  ;;  %v331_v9 = vadd.s32 56, %v1762_v2 }
  0x2a   : > { %v379_v10 = vld [vmem:[%s1773_s27] sm:$0xff]  ;;  %vm383_vm0 = vcmask 523264   ;;  %vm348_vm1 = vcmask 7168   ;;  %v1637_v12 = vmov 0.0   ;;  %v1638_v14 = vmov 1.0   ;;  %v380_v15 = vld [vmem:[%s1773_s27 + $0x8] sm:$0xff] }
  0x2b   : > { %1350 = vmatprep.mubr.msk.f32.mxu0 %vm383_vm0, %v379_v10  ;;  %v472_v11 = vmul.f32 %v379_v10, %v379_v10  ;;  %350 = vst.msk [vmem:[#allocation2 + $0x8] sm:$0xff] %vm348_vm1, %v1637_v12  ;;  %715 = vst.msk [vmem:[#allocation4] sm:$0xff] %vm348_vm1, %v1637_v12  ;;  %v354_v13 = vstv %s353_s13  ;;  %v473_v16 = vmul.f32 %v380_v15, %v380_v15  ;;  %v599_v17 = vld [vmem:[%s1987_s3] sm:$0xff]  ;;  %vm603_vm10 = vcmask 261120   ;;  %v601_v18 = vld [vmem:[%s1987_s3 + $0x10] sm:$0xff] }
  0x2c   : > { %716 = vst.msk [vmem:[#allocation4 + $0x8] sm:$0xff] %vm348_vm1, %v1637_v12  ;;  %349 = vst.msk [vmem:[#allocation2] sm:$0xff] %vm348_vm1, %v1637_v12  ;;  %vm362_vm2 = vcmp.lt.s32.totalorder %v331_v9, %v354_v13  ;;  %vm361_vm3 = vcmp.lt.s32.totalorder %v330_v8, %v354_v13  ;;  %vm360_vm4 = vcmp.lt.s32.totalorder %v329_v7, %v354_v13  ;;  %v600_v57 = vld [vmem:[%s1987_s3 + $0x8] sm:$0xff]  ;;  %v602_v58 = vld [vmem:[%s1987_s3 + $0x18] sm:$0xff] }
  0x2d   : > { %351 = vst.msk [vmem:[#allocation3] sm:$0xff] %vm348_vm1, %v1637_v12  ;;  %352 = vst.msk [vmem:[#allocation3 + $0x8] sm:$0xff] %vm348_vm1, %v1637_v12  ;;  %1369 = vmatprep.mubr.msk.f32.mxu1 %vm383_vm0, %v472_v11  ;;  %1334 = vmatprep.subr.msk.mxu0 %vm362_vm2, %v1638_v14  ;;  %vm359_vm5 = vcmp.lt.s32.totalorder %v328_v6, %v354_v13  ;;  %vm358_vm6 = vcmp.lt.s32.totalorder %v327_v5, %v354_v13  ;;  %s563_s25 = scvt.s32.f32 %s562_s24  ;;  %v596_v59 = vld [vmem:[%s1988_s4 + $0x8] sm:$0xff]  ;;  %v598_v60 = vld [vmem:[%s1988_s4 + $0x18] sm:$0xff] }
  0x2e   : > { %1353 = vmatprep.subr.msk.mxu1 %vm362_vm2, %v1638_v14  ;;  %1335 = vmatpush3.msk.msra.mxu0 %vm362_vm2, %v1638_v14  ;;  %vm357_vm7 = vcmp.lt.s32.totalorder %v326_v4, %v354_v13  ;;  %vm356_vm8 = vcmp.lt.s32.totalorder %v1765_v3, %v354_v13  ;;  %vm355_vm9 = vcmp.lt.s32.totalorder %v1762_v2, %v354_v13  ;;  %v595_v63 = vld [vmem:[%s1988_s4] sm:$0xff]  ;;  %v597_v0 = vld [vmem:[%s1988_s4 + $0x10] sm:$0xff] }
  0x2f   : > { %1354 = vmatpush3.msk.msra.mxu1 %vm362_vm2, %v1638_v14  ;;  %1336 = vmatprep.subr.msk.mxu0 %vm361_vm3, %v1638_v14  ;;  %s564_s13 = smax.f32 %s1639_s26, %s563_s25 }
  0x30   : > { %1355 = vmatprep.subr.msk.mxu1 %vm361_vm3, %v1638_v14  ;;  %1337 = vmatpush3.msk.msra.mxu0 %vm361_vm3, %v1638_v14  ;;  %v567_v19 = vstv %s564_s13 }
  0x31   : > { %1356 = vmatpush3.msk.msra.mxu1 %vm361_vm3, %v1638_v14  ;;  %1338 = vmatprep.subr.msk.mxu0 %vm360_vm4, %v1638_v14  ;;  %1494 = vrcp.f32 %v567_v19 }
  0x32   : > { %1357 = vmatprep.subr.msk.mxu1 %vm360_vm4, %v1638_v14  ;;  %1339 = vmatpush3.msk.msra.mxu0 %vm360_vm4, %v1638_v14  ;;  %v382_v20 = vld [vmem:[#allocation2 + $0x8] sm:$0xff] }
  0x33   : > { %1358 = vmatpush3.msk.msra.mxu1 %vm360_vm4, %v1638_v14  ;;  %1340 = vmatprep.subr.msk.mxu0 %vm359_vm5, %v1638_v14  ;;  %v381_v24 = vld [vmem:[#allocation2] sm:$0xff] }
  0x34   : > { %1359 = vmatprep.subr.msk.mxu1 %vm359_vm5, %v1638_v14  ;;  %1341 = vmatpush3.msk.msra.mxu0 %vm359_vm5, %v1638_v14  ;;  %v471_v21 = vld [vmem:[#allocation3 + $0x8] sm:$0xff]  ;;  %v470_v25 = vld [vmem:[#allocation3] sm:$0xff] }
  0x35   : > { %1360 = vmatpush3.msk.msra.mxu1 %vm359_vm5, %v1638_v14  ;;  %1342 = vmatprep.subr.msk.mxu0 %vm358_vm6, %v1638_v14 }
  0x36   : > { %1361 = vmatprep.subr.msk.mxu1 %vm358_vm6, %v1638_v14  ;;  %1343 = vmatpush3.msk.msra.mxu0 %vm358_vm6, %v1638_v14 }
  0x37   : > { %1362 = vmatpush3.msk.msra.mxu1 %vm358_vm6, %v1638_v14  ;;  %1344 = vmatprep.subr.msk.mxu0 %vm357_vm7, %v1638_v14 }
  0x38   : > { %1363 = vmatprep.subr.msk.mxu1 %vm357_vm7, %v1638_v14  ;;  %1345 = vmatpush3.msk.msra.mxu0 %vm357_vm7, %v1638_v14 }
  0x39   : > { %1364 = vmatpush3.msk.msra.mxu1 %vm357_vm7, %v1638_v14  ;;  %1346 = vmatprep.subr.msk.mxu0 %vm356_vm8, %v1638_v14 }
  0x3a   : > { %1365 = vmatprep.subr.msk.mxu1 %vm356_vm8, %v1638_v14  ;;  %1347 = vmatpush3.msk.msra.mxu0 %vm356_vm8, %v1638_v14 }
  0x3b   : > { %1366 = vmatpush3.msk.msra.mxu1 %vm356_vm8, %v1638_v14  ;;  %1348 = vmatprep.subr.msk.mxu0 %vm355_vm9, %v1638_v14 }
  0x3c   : > { %1367 = vmatprep.subr.msk.mxu1 %vm355_vm9, %v1638_v14  ;;  %1349 = vmatpush3.msk.msra.mxu0 %vm355_vm9, %v1638_v14 }
  0x3d   : > { %1368 = vmatpush3.msk.msra.mxu1 %vm355_vm9, %v1638_v14  ;;  %1351 = vmatmul.mubr.msk.f32.vlgmr.msra.gmra.mxu0 %vm383_vm0, %v380_v15 }
  0x3e   : > { %1370 = vmatmul.mubr.msk.f32.vlgmr.msra.gmra.mxu1 %vm383_vm0, %v473_v16  ;;  %1380 = vmatprep.mubr.msk.f32.mxu0 %vm603_vm10, %v599_v17  ;;  %v1495_v32 = vpop.eup %1494 }
  0x3f   : > { %1383 = vmatprep.mubr.msk.f32.mxu1 %vm603_vm10, %v601_v18 }
  0xfd   : > { %v1352_v22 = vpop.f32.mrf.mxu0 }
  0xfe   : > { %v1371_v23 = vpop.f32.mrf.mxu1  ;;  %v466_v26 = vadd.f32 %v1352_v22, %v382_v20 }
  0xff   : > { %v556_v27 = vadd.f32 %v1371_v23, %v471_v21  ;;  %v456_v28 = vpop.f32.mrf.mxu0 }
 0x100   : > { %v546_v29 = vpop.f32.mrf.mxu1  ;;  %469 = vst.msk [vmem:[#allocation2 + $0x8] sm:$0xff] %vm348_vm1, %v466_v26  ;;  %v465_v30 = vadd.f32 %v456_v28, %v381_v24 }
 0x101   : > { %558 = vst.msk [vmem:[#allocation3 + $0x8] sm:$0xff] %vm348_vm1, %v556_v27  ;;  %v555_v31 = vadd.f32 %v546_v29, %v470_v25 }
 0x102   : > { %468 = vst.msk [vmem:[#allocation2] sm:$0xff] %vm348_vm1, %v465_v30 }
 0x103   : > { %557 = vst.msk [vmem:[#allocation3] sm:$0xff] %vm348_vm1, %v555_v31 }
 0x107   : > { %v566_v33 = vld [vmem:[#allocation2 + $0x8] sm:$0xff] }
 0x108   : > { %v572_v34 = vld [vmem:[#allocation3 + $0x8] sm:$0xff]  ;;  %v570_v35 = vmul.f32 %v1495_v32, %v566_v33  ;;  %712 = vst.msk [vmem:[#allocation2 + $0x8] sm:$0xff] %vm348_vm1, %v1637_v12 }
 0x109   : > { %v574_v36 = vmul.f32 %v1495_v32, %v572_v34  ;;  %714 = vst.msk [vmem:[#allocation3 + $0x8] sm:$0xff] %vm348_vm1, %v1637_v12  ;;  %v565_v37 = vld [vmem:[#allocation2] sm:$0xff] }
 0x10a   : > { %v571_v38 = vld [vmem:[#allocation3] sm:$0xff]  ;;  %710 = vst.msk [vmem:[#allocation5 + $0x8] sm:$0xff] %vm348_vm1, %v570_v35  ;;  %v576_v39 = vmul.f32 %v570_v35, %v570_v35  ;;  %v569_v40 = vmul.f32 %v1495_v32, %v565_v37  ;;  %711 = vst.msk [vmem:[#allocation2] sm:$0xff] %vm348_vm1, %v1637_v12 }
 0x10b   : > { %713 = vst.msk [vmem:[#allocation3] sm:$0xff] %vm348_vm1, %v1637_v12  ;;  %v573_v42 = vmul.f32 %v1495_v32, %v571_v38 }
 0x10c   : > { %v578_v41 = vsub.f32 %v574_v36, %v576_v39  ;;  %709 = vst.msk [vmem:[#allocation5] sm:$0xff] %vm348_vm1, %v569_v40  ;;  %v575_v43 = vmul.f32 %v569_v40, %v569_v40 }
 0x10e   : > { %v580_v44 = vmax.f32 %v578_v41, 1e-12  ;;  %v577_v45 = vsub.f32 %v573_v42, %v575_v43 }
 0x110   : > { %v579_v46 = vmax.f32 %v577_v45, 1e-12  ;;  %1496 = vrsqrt.f32 %v580_v44  ;;  %vm590_vm11 = vcmp.eq.f32.partialorder %v580_v44, inf  ;;  %v593_v50 = vand.u32 2147483648, %v580_v44 }
 0x111   : > { %vm592_vm12 = vcmp.eq.f32.partialorder %v580_v44, 0.0 }
 0x112   : > { %1498 = vrsqrt.f32 %v579_v46  ;;  %vm583_vm13 = vcmp.eq.f32.partialorder %v579_v46, inf  ;;  %v586_v54 = vand.u32 2147483648, %v579_v46  ;;  %vm585_vm14 = vcmp.eq.f32.partialorder %v579_v46, 0.0 }
 0x11d   : > { %v1497_v47 = vpop.eup %1496 }
 0x11e   : > { %v589_v48 = vmul.f32 %v1497_v47, %v580_v44 }
 0x11f   : > { %v1499_v49 = vpop.eup %1498 }
 0x120   : > { %v591_v51 = vsel %vm590_vm11, %v580_v44, %v589_v48  ;;  %v582_v52 = vmul.f32 %v1499_v49, %v579_v46 }
 0x121   : > { %v594_v53 = vsel %vm592_vm12, %v593_v50, %v591_v51 }
 0x122   : > { %1372 = vmatprep.subr.mxu0 %v594_v53  ;;  %1407 = vmatprep.subr.mxu1 %v594_v53  ;;  %v584_v55 = vsel %vm583_vm13, %v579_v46, %v582_v52 }
 0x123   : > { %1373 = vmatpush3.msra.mxu0 %v594_v53  ;;  %1411 = vmatpush3.msra.mxu1 %v594_v53  ;;  %v587_v56 = vsel %vm585_vm14, %v586_v54, %v584_v55 }
 0x124   : > { %1374 = vmatprep.subr.mxu0 %v587_v56  ;;  %1408 = vmatprep.subr.mxu1 %v587_v56 }
 0x125   : > { %1375 = vmatpush3.msra.mxu0 %v587_v56  ;;  %1412 = vmatpush3.msra.mxu1 %v587_v56 }
 0x126   : > { %1376 = vmatprep.subr.mxu0 %v570_v35  ;;  %1409 = vmatprep.subr.mxu1 %v570_v35 }
 0x127   : > { %1377 = vmatpush3.msra.mxu0 %v570_v35  ;;  %1413 = vmatpush3.msra.mxu1 %v570_v35 }
 0x128   : > { %1378 = vmatprep.subr.mxu0 %v569_v40  ;;  %1410 = vmatprep.subr.mxu1 %v569_v40 }
 0x129   : > { %1379 = vmatpush3.msra.mxu0 %v569_v40  ;;  %1414 = vmatpush3.msra.mxu1 %v569_v40 }
 0x12a   : > { %1381 = vmatmul.mubr.msk.f32.vlgmr.msra.gmra.mxu0 %vm603_vm10, %v600_v57  ;;  %1384 = vmatmul.mubr.msk.f32.vlgmr.msra.gmra.mxu1 %vm603_vm10, %v602_v58 }
 0x1ea   : > { %v1382_v61 = vpop.f32.mrf.mxu0  ;;  %v1385_v62 = vpop.f32.mrf.mxu1 }
 0x1eb   : > { %v702_v3 = vadd.f32 %v1382_v61, %v596_v59  ;;  %v704_v4 = vadd.f32 %v1385_v62, %v598_v60 }
 0x1ec   : > { %v682_v5 = vpop.f32.mrf.mxu0  ;;  %v692_v6 = vpop.f32.mrf.mxu1 }
 0x1ed   : > { %706 = vst.msk [vmem:[#allocation6 + $0x8] sm:$0xff] %vm348_vm1, %v702_v3  ;;  %708 = vst.msk [vmem:[#allocation6 + $0x18] sm:$0xff] %vm348_vm1, %v704_v4  ;;  %v701_v7 = vadd.f32 %v682_v5, %v595_v63  ;;  %v703_v8 = vadd.f32 %v692_v6, %v597_v0 }
 0x1ef   : > { %705 = vst.msk [vmem:[#allocation6] sm:$0xff] %vm348_vm1, %v701_v7  ;;  %707 = vst.msk [vmem:[#allocation6 + $0x10] sm:$0xff] %vm348_vm1, %v703_v8 }
 0x1f0 PF: > { %p1282_p5 = scmp.ne.s32.totalorder %s1618_s8, 1 }
 0x1f2   : > { %720 = sbr.rel (%p1282_p5) target bundleno = 1268 (0x4f4), region = 60 }
 0x1f7   : > { %v1853_v9 = vld [vmem:[%s1773_s27 + $0x8] sm:$0xff]  ;;  %v1856_v10 = vld [vmem:[%s1773_s27] sm:$0xff]  ;;  %vm760_vm15 = vcmask 130048   ;;  %v1640_v13 = vmov 0   ;;  %v739_v15 = vld [vmem:[#allocation6 + $0x18] sm:$0xff]  ;;  %v1641_v20 = vmov 1  }
 0x1f8   : > { %v732_v11 = vld [vmem:[%s1986_s2] sm:$0xff]  ;;  %1386 = vmatprep.subr.mxu0 %v1853_v9  ;;  %v733_v12 = vld [vmem:[%s1986_s2 + $0x8] sm:$0xff]  ;;  %1501 = vset.pattern.permute.xlu1 %v1640_v13  ;;  %v734_v16 = vld [vmem:[%s1986_s2 + $0x10] sm:$0xff]  ;;  %v1642_v24 = vmov 2   ;;  %vm924_vm0 = vcmask 261120   ;;  %s725_s27 = sld [smem:[#allocation8 + %s1622_s9]] }
 0x1f9   : > { %1390 = vmatprep.mubr.msk.f32.mxu0 %vm760_vm15, %v732_v11  ;;  %1387 = vmatpush3.msra.mxu0 %v1853_v9  ;;  %v737_v14 = vld [vmem:[#allocation6 + $0x8] sm:$0xff]  ;;  %v724_v17 = vld [vmem:[%s1988_s4 + $0x18] sm:$0xff]  ;;  %v738_v19 = vld [vmem:[#allocation6 + $0x10] sm:$0xff]  ;;  %vm1030_vm2 = vcmask 523264   ;;  %vm1039_vm3 = vcmask 7168   ;;  %vm1135_vm8 = vcmask 130112  }
 0x1fa   : > { %1388 = vmatprep.subr.mxu0 %v1856_v10  ;;  %747 = vperm.xlu1 %1501, %v737_v14   ;;  %v735_v18 = vld [vmem:[%s1986_s2 + $0x18] sm:$0xff]  ;;  %v723_v21 = vld [vmem:[%s1988_s4 + $0x10] sm:$0xff]  ;;  %v736_v22 = vld [vmem:[#allocation6] sm:$0xff]  ;;  %vm1142_vm9 = vcmask 195712   ;;  %vm1149_vm10 = vcmask 261312   ;;  %vm1152_vm11 = vcmask 253952  }
 0x1fb   : > { %1389 = vmatpush3.msra.mxu0 %v1856_v10  ;;  %1500 = vset.pattern.permute.xlu0 %v1640_v13  ;;  %v722_v23 = vld [vmem:[%s1988_s4 + $0x8] sm:$0xff]  ;;  %v721_v25 = vld [vmem:[%s1988_s4] sm:$0xff]  ;;  %v1900_v29 = vld [vmem:[#allocation5 + $0x8] sm:$0xff] }
 0x1fc   : > { %1391 = vmatmul.mubr.msk.f32.vlgmr.msra.gmra.mxu0 %vm760_vm15, %v733_v12  ;;  %757 = vperm.xlu0 %1500, %v739_v15   ;;  %v910_v26 = vld [vmem:[%s1989_s5] sm:$0xff]  ;;  %v913_v28 = vld [vmem:[%s1990_s6 + $0x8] sm:$0xff]  ;;  %v1902_v30 = vld [vmem:[#allocation5] sm:$0xff] }
 0x1fd   : > { %1393 = vmatprep.mubr.msk.f32.mxu0 %vm760_vm15, %v734_v16  ;;  %1404 = vmatprep.mubr.msk.f32.mxu1 %vm924_vm0, %v910_v26  ;;  %v912_v27 = vld [vmem:[%s1990_s6] sm:$0xff]  ;;  %v911_v5 = vld [vmem:[%s1989_s5 + $0x8] sm:$0xff] }
 0x1fe   : > { %1502 = vset.pattern.permute.xlu1 %v1641_v20  ;;  %v726_v16 = vstv %s725_s27 }
 0x1ff   : > { %879 = vperm.xlu1 %1502, %v724_v17   ;;  %vm727_vm1 = vcmp.lt.s32.totalorder %v1760_v1, %v726_v16 }
 0x200   : > { %1394 = vmatmul.mubr.msk.f32.gmra.mxu0 %vm760_vm15, %v735_v18  ;;  %752 = vperm.xlu0 %1500, %v738_v19  }
 0x203   : > { %874 = vperm.xlu1 %1502, %v723_v21  }
 0x204   : > { %742 = vperm.xlu0 %1500, %v736_v22  }
 0x207   : > { %869 = vperm.xlu1 %1502, %v722_v23  }
 0x208   : > { %1503 = vset.pattern.permute.xlu0 %v1642_v24 }
 0x209   : > { %899 = vperm.xlu0 %1503, %v724_v17   ;;  %v1643_v17 = vmov 0.0  }
 0x20a   : > { %v1283_v18 = vsel %vm727_vm1, 1.0, %v1643_v17 }
 0x20b   : > { %1504 = vset.pattern.permute.xlu1 %v1642_v24 }
 0x20c   : > { %895 = vperm.xlu1 %1504, %v723_v21  }
 0x20d   : > { %1505 = vset.pattern.permute.xlu0 %v1641_v20 }
 0x20e   : > { %864 = vperm.xlu0 %1505, %v721_v25  }
 0x210   : > { %891 = vperm.xlu1 %1504, %v722_v23  }
 0x212   : > { %1506 = vset.pattern.permute.xlu0 %v1640_v13 }
 0x213   : > { %916 = vperm.xlu0 %1506, %v912_v27  }
 0x214   : > { %887 = vperm.xlu1 %1504, %v721_v25  }
 0x217   : > { %1021 = vperm.xlu0 %1506, %v1900_v29  }
 0x218   : > { %1507 = vset.pattern.permute.xlu1 %v1640_v13 }
 0x219   : > { %921 = vperm.xlu1 %1507, %v913_v28  }
 0x21d   : > { %1016 = vperm.xlu1 %1507, %v1902_v30  }
 0x275   : > { %v748_v31 = vpop.permute.xlu1 %747 }
 0x277   : > { %v758_v33 = vpop.permute.xlu0 %757 }
 0x27a   : > { %v880_v32 = vpop.permute.xlu1 %879 }
 0x27b   : > { %v753_v35 = vpop.permute.xlu0 %752 }
 0x27e   : > { %v875_v34 = vpop.permute.xlu1 %874 }
 0x27f   : > { %v743_v37 = vpop.permute.xlu0 %742 }
 0x282   : > { %v870_v36 = vpop.permute.xlu1 %869 }
 0x284   : > { %v900_v42 = vpop.permute.xlu0 %899 }
 0x287   : > { %v896_v39 = vpop.permute.xlu1 %895 }
 0x289   : > { %v865_v52 = vpop.permute.xlu0 %864 }
 0x28b   : > { %v892_v47 = vpop.permute.xlu1 %891 }
 0x28e   : > { %v917_v11 = vpop.permute.xlu0 %916 }
 0x28f   : > { %v888_v59 = vpop.permute.xlu1 %887 }
 0x292   : > { %v1022_v20 = vpop.permute.xlu0 %1021 }
 0x293   : > { %v1025_v24 = vsub.f32 %v1853_v9, %v1022_v20 }
 0x294   : > { %v922_v6 = vpop.permute.xlu1 %921 }
 0x298   : > { %v1017_v21 = vpop.permute.xlu1 %1016 }
 0x299   : > { %v1024_v25 = vsub.f32 %v1856_v10, %v1017_v21 }
 0x2bc   : > { %v1392_v38 = vpop.f32.mrf.mxu0 }
 0x2bd   : > { %v845_v40 = vadd.f32 %v1392_v38, %v748_v31 }
 0x2be   : > { %v839_v41 = vpop.f32.mrf.mxu0 }
 0x2bf   : > { %v840_v43 = vadd.f32 %v839_v41, %v743_v37  ;;  %v859_v45 = vmax.f32 %v845_v40, 0.0  ;;  %v1029_v37 = vld [vmem:[#allocation4 + $0x8] sm:$0xff] }
 0x2c0   : > { %v1395_v44 = vpop.f32.mrf.mxu0 }
 0x2c1   : > { %v855_v46 = vadd.f32 %v1395_v44, %v758_v33  ;;  %v858_v49 = vmax.f32 %v840_v43, 0.0  ;;  %v883_v54 = vmul.f32 %v870_v36, %v859_v45  ;;  %v1043_v45 = vld [vmem:[#allocation2 + $0x8] sm:$0xff] }
 0x2c2   : > { %v849_v48 = vpop.f32.mrf.mxu0 }
 0x2c3   : > { %v861_v50 = vmax.f32 %v855_v46, 0.0  ;;  %v850_v51 = vadd.f32 %v849_v48, %v753_v35  ;;  %v882_v58 = vmul.f32 %v865_v52, %v858_v49  ;;  %v903_v60 = vadd.f32 %v892_v47, %v883_v54  ;;  %v1054_v48 = vld [vmem:[#allocation3] sm:$0xff] }
 0x2c5   : > { %v885_v53 = vmul.f32 %v880_v32, %v861_v50  ;;  %v860_v55 = vmax.f32 %v850_v51, 0.0  ;;  %v902_v62 = vadd.f32 %v888_v59, %v882_v58  ;;  %v1055_v51 = vld [vmem:[#allocation3 + $0x8] sm:$0xff] }
 0x2c7   : > { %v905_v56 = vadd.f32 %v900_v42, %v885_v53  ;;  %v884_v57 = vmul.f32 %v875_v34, %v860_v55  ;;  %v1042_v42 = vld [vmem:[#allocation2] sm:$0xff] }
 0x2c9   : > { %1508 = vtanh.f32 %v905_v56  ;;  %v904_v61 = vadd.f32 %v896_v39, %v884_v57  ;;  %v1028_v39 = vld [vmem:[#allocation4] sm:$0xff] }
 0x2cb   : > { %1510 = vtanh.f32 %v904_v61 }
 0x2cc   : > { %1512 = vtanh.f32 %v903_v60 }
 0x2cd   : > { %1514 = vtanh.f32 %v902_v62 }
 0x2d6   : > { %v1509_v63 = vpop.eup %1508 }
 0x2d7   : > { %1396 = vmatprep.subr.mxu1 %v1509_v63 }
 0x2d8   : > { %v1511_v0 = vpop.eup %1510  ;;  %1397 = vmatpush3.msra.mxu1 %v1509_v63 }
 0x2d9   : > { %1398 = vmatprep.subr.mxu1 %v1511_v0  ;;  %v1513_v3 = vpop.eup %1512 }
 0x2da   : > { %1399 = vmatpush3.msra.mxu1 %v1511_v0  ;;  %v1515_v4 = vpop.eup %1514 }
 0x2db   : > { %1400 = vmatprep.subr.mxu1 %v1513_v3 }
 0x2dc   : > { %1401 = vmatpush3.msra.mxu1 %v1513_v3 }
 0x2dd   : > { %1402 = vmatprep.subr.mxu1 %v1515_v4 }
 0x2de   : > { %1403 = vmatpush3.msra.mxu1 %v1515_v4 }
 0x2df   : > { %1405 = vmatmul.mubr.msk.f32.vlgmr.msra.gmra.mxu1 %vm924_vm0, %v911_v5 }
 0x39f   : > { %v1406_v7 = vpop.f32.mrf.mxu1 }
 0x3a0   : > { %v1003_v8 = vadd.f32 %v1406_v7, %v922_v6 }
 0x3a1   : > { %v997_v12 = vpop.f32.mrf.mxu1 }
 0x3a2   : > { %v1008_v13 = vmul.f32 1.442695, %v1003_v8  ;;  %v998_v14 = vadd.f32 %v997_v12, %v917_v11 }
 0x3a4   : > { %1516 = vpow2.f32 %v1008_v13  ;;  %v1006_v15 = vmul.f32 1.442695, %v998_v14 }
 0x3a6   : > { %1518 = vpow2.f32 %v1006_v15 }
 0x3b1   : > { %v1517_v19 = vpop.eup %1516 }
 0x3b2   : > { %v1011_v22 = vmul.f32 %v1517_v19, %v1283_v18 }
 0x3b3   : > { %v1519_v23 = vpop.eup %1518 }
 0x3b4   : > { %v1034_v26 = vsel %vm1030_vm2, %v1011_v22, 0.0  ;;  %v1010_v27 = vmul.f32 %v1519_v23, %v1283_v18  ;;  %v1027_v32 = vmul.f32 %v1025_v24, %v1011_v22  ;;  %v1130_v23 = vadd.s32 4294967288, %v1760_v1 }
 0x3b5   : > { %1035 = vadd.xlane.f32.xlu0 %v1034_v26  ;;  %v1144_v26 = vadd.s32 4294967272, %v1760_v1 }
 0x3b6   : > { %v1031_v28 = vsel %vm1030_vm2, %v1010_v27, 0.0  ;;  %v1026_v31 = vmul.f32 %v1024_v25, %v1010_v27  ;;  %v1047_v35 = vsel %vm1030_vm2, %v1027_v32, 0.0  ;;  %v1057_v36 = vmul.f32 %v1027_v32, %v1025_v24 }
 0x3b7   : > { %1032 = vadd.xlane.f32.xlu1 %v1031_v28  ;;  %v1137_v24 = vadd.s32 4294967280, %v1760_v1  ;;  %v1133_v28 = vsub.s32 %v1130_v23, %v1762_v2 }
 0x3b8   : > { %v1044_v33 = vsel %vm1030_vm2, %v1026_v31, 0.0  ;;  %v1056_v34 = vmul.f32 %v1026_v31, %v1024_v25  ;;  %v1061_v10 = vsel %vm1030_vm2, %v1057_v36, 0.0  ;;  %v1128_v25 = vsub.s32 %v1760_v1, %v1762_v2 }
 0x3b9   : > { %1045 = vadd.xlane.f32.xlu0 %v1044_v33  ;;  %v1140_v32 = vsub.s32 %v1137_v24, %v1762_v2 }
 0x3ba   : > { %v1058_v9 = vsel %vm1030_vm2, %v1056_v34, 0.0  ;;  %v1147_v34 = vsub.s32 %v1144_v26, %v1762_v2 }
 0x3bb   : > { %1048 = vadd.xlane.f32.xlu1 %v1047_v35 }
 0x3bd   : > { %1059 = vadd.xlane.f32.xlu0 %v1058_v9 }
 0x3bf   : > { %1062 = vadd.xlane.f32.xlu1 %v1061_v10 }
 0x43e   : > { %v1036_v38 = vpop.xlane.xlu0 %1035 }
 0x43f   : > { %v1038_v40 = vadd.f32 %v1036_v38, %v1029_v37 }
 0x440   : > { %v1033_v41 = vpop.xlane.xlu1 %1032 }
 0x441   : > { %1041 = vst.msk [vmem:[#allocation4 + $0x8] sm:$0xff] %vm1039_vm3, %v1038_v40  ;;  %v1037_v43 = vadd.f32 %v1033_v41, %v1028_v39 }
 0x442   : > { %v1046_v44 = vpop.xlane.xlu0 %1045 }
 0x443   : > { %1040 = vst.msk [vmem:[#allocation4] sm:$0xff] %vm1039_vm3, %v1037_v43  ;;  %v1050_v46 = vadd.f32 %v1046_v44, %v1042_v42 }
 0x444   : > { %v1049_v47 = vpop.xlane.xlu1 %1048 }
 0x445   : > { %1052 = vst.msk [vmem:[#allocation2] sm:$0xff] %vm1039_vm3, %v1050_v46  ;;  %v1051_v49 = vadd.f32 %v1049_v47, %v1043_v45 }
 0x446   : > { %v1060_v50 = vpop.xlane.xlu0 %1059 }
 0x447   : > { %1053 = vst.msk [vmem:[#allocation2 + $0x8] sm:$0xff] %vm1039_vm3, %v1051_v49  ;;  %v1064_v52 = vadd.f32 %v1060_v50, %v1054_v48 }
 0x448   : > { %v1063_v53 = vpop.xlane.xlu1 %1062  ;;  %v1073_v54 = vld [vmem:[#allocation4 + $0x8] sm:$0xff] }
 0x449   : > { %1066 = vst.msk [vmem:[#allocation3] sm:$0xff] %vm1039_vm3, %v1064_v52  ;;  %v1065_v55 = vadd.f32 %v1063_v53, %v1055_v51  ;;  %1520 = vrcp.f32 %v1073_v54 }
 0x44a   : > { %v1072_v56 = vld [vmem:[#allocation4] sm:$0xff] }
 0x44b   : > { %1067 = vst.msk [vmem:[#allocation3 + $0x8] sm:$0xff] %vm1039_vm3, %v1065_v55  ;;  %1522 = vrcp.f32 %v1072_v56 }
 0x44c   : > { %v1078_v62 = vld [vmem:[#allocation2] sm:$0xff] }
 0x44e   : > { %v1079_v58 = vld [vmem:[#allocation2 + $0x8] sm:$0xff] }
 0x450   : > { %v1086_v5 = vld [vmem:[#allocation3] sm:$0xff] }
 0x452   : > { %v1087_v61 = vld [vmem:[#allocation3 + $0x8] sm:$0xff] }
 0x456   : > { %v1521_v57 = vpop.eup %1520 }
 0x457   : > { %v1081_v59 = vmul.f32 %v1521_v57, %v1079_v58  ;;  %v1089_v0 = vmul.f32 %v1521_v57, %v1087_v61 }
 0x458   : > { %v1523_v60 = vpop.eup %1522 }
 0x459   : > { %v1085_v63 = vadd.f32 %v1081_v59, %v1900_v29  ;;  %v1091_v3 = vmul.f32 %v1081_v59, %v1081_v59  ;;  %v1080_v4 = vmul.f32 %v1523_v60, %v1078_v62  ;;  %v1088_v11 = vmul.f32 %v1523_v60, %v1086_v5 }
 0x45b   : > { %v1093_v6 = vsub.f32 %v1089_v0, %v1091_v3  ;;  %1118 = vperm.xlu1 %1507, %v1085_v63   ;;  %v1084_v7 = vadd.f32 %v1080_v4, %v1902_v30  ;;  %v1090_v8 = vmul.f32 %v1080_v4, %v1080_v4 }
 0x45d   : > { %v1095_v12 = vmax.f32 %v1093_v6, 1e-12  ;;  %1115 = vperm.xlu0 %1506, %v1084_v7   ;;  %v1092_v13 = vsub.f32 %v1088_v11, %v1090_v8 }
 0x45f   : > { %v1094_v14 = vmax.f32 %v1092_v13, 1e-12  ;;  %1524 = vrsqrt.f32 %v1095_v12  ;;  %vm1105_vm4 = vcmp.eq.f32.partialorder %v1095_v12, inf  ;;  %v1108_v29 = vand.u32 2147483648, %v1095_v12 }
 0x460   : > { %vm1107_vm5 = vcmp.eq.f32.partialorder %v1095_v12, 0.0 }
 0x461   : > { %1526 = vrsqrt.f32 %v1094_v14  ;;  %vm1098_vm6 = vcmp.eq.f32.partialorder %v1094_v14, inf  ;;  %v1101_v21 = vand.u32 2147483648, %v1094_v14  ;;  %vm1100_vm7 = vcmp.eq.f32.partialorder %v1094_v14, 0.0 }
 0x46c   : > { %v1525_v15 = vpop.eup %1524 }
 0x46d   : > { %v1104_v16 = vmul.f32 %v1525_v15, %v1095_v12 }
 0x46e   : > { %v1527_v17 = vpop.eup %1526 }
 0x46f   : > { %v1106_v18 = vsel %vm1105_vm4, %v1095_v12, %v1104_v16  ;;  %v1097_v19 = vmul.f32 %v1527_v17, %v1094_v14 }
 0x470   : > { %v1109_v20 = vsel %vm1107_vm5, %v1108_v29, %v1106_v18 }
 0x471   : > { %1124 = vperm.xlu0 %1506, %v1109_v20   ;;  %v1099_v30 = vsel %vm1098_vm6, %v1094_v14, %v1097_v19 }
 0x472   : > { %v1102_v22 = vsel %vm1100_vm7, %v1101_v21, %v1099_v30 }
 0x473   : > { %1121 = vperm.xlu1 %1507, %v1102_v22  }
 0x4d6   : > { %v1119_v31 = vpop.permute.xlu1 %1118 }
 0x4d7   : > { %v1134_v36 = vrot.slane %v1119_v31, %v1133_v28 }
 0x4d8   : > { %v1116_v27 = vpop.permute.xlu0 %1115 }
 0x4d9   : > { %v1129_v33 = vrot.slane %v1116_v27, %v1128_v25 }
 0x4db   : > { %v1136_v37 = vsel %vm1135_vm8, %v1134_v36, %v1129_v33 }
 0x4ec   : > { %v1125_v35 = vpop.permute.xlu0 %1124 }
 0x4ed   : > { %v1148_v38 = vrot.slane %v1125_v35, %v1147_v34 }
 0x4ee   : > { %v1122_v9 = vpop.permute.xlu1 %1121 }
 0x4ef   : > { %v1141_v10 = vrot.slane %v1122_v9, %v1140_v32 }
 0x4f1   : > { %v1143_v1 = vsel %vm1142_vm9, %v1141_v10, %v1136_v37 }
 0x4f2   : > { %v1150_v39 = vsel %vm1149_vm10, %v1148_v38, %v1143_v1 }
 0x4f3   : > { %1153 = vst.msk [vmem:[%s1780_s28] sm:$0x1] %vm1152_vm11, %v1150_v39 }
 0x4f4 PF: > { %s1290_s13 = sshll.u32 %s1622_s9, 4  ;;  %s1167_s23 = sshll.u32 %s1780_s28, 4  ;;  %s1168_s23 = int_to_ptr.vmem [resolvable:$true] %s1167_s23 }
 0x4f5   : > { %s1165_s20 = scalar_lea.hbm %s1991_s7, %s1290_s13  ;;  %s1155_s24 = scalar_lea.sflag [#allocation10], %s296_s22 }
 0x4f6   : > { %s1540_s25 = scalar_lea.vmem %s1168_s23, 16  ;;  %s1644_s26 = smov [#allocation9]  }
 0x4f7   : > { %p1541_p6 = scmp.ne.s32.totalorder %s1168_s23, %s1540_s25  ;;  %s1544_s8 = sshll.u32 %s1644_s26, 4  ;;  %s1545_s8 = int_to_ptr.vmem [resolvable:$false] %s1544_s8 }
 0x4f8   : > { %s1546_s27 = scalar_lea.vmem %s1545_s8, 32  ;;  %p1547_p10 = scmp.lt.s32.totalorder %s1168_s23, %s1545_s8 }
 0x4f9   : > { %p1542_p7 = pnand %p1541_p6, %p1737_p8  ;;  %p1548_p11 = scmp.lt.s32.totalorder %s1546_s27, %s1540_s25 }
 0x4fb   : > { %p1543_p9 = pneg %p1542_p7  ;;  %p1549_p12 = por %p1548_p11, %p1547_p10 }
 0x4fd   : > { %p1550_p13 = pnand %p1549_p12, %p1543_p9 }
 0x4ff   : > { %1553 = shalt.err (!%p1550_p13)
}
 0x500   : > { %s1554_s9 = scalar_lea.hbm %s1165_s20, 16  ;;  %s1558_s13 = scalar_lea.hbm %s1991_s7, 32 }
 0x501   : > { %p1555_p1 = scmp.ne.s32.totalorder %s1165_s20, %s1554_s9  ;;  %p1559_p4 = scmp.lt.s32.totalorder %s1165_s20, %s1991_s7 }
 0x502   : > { %p1560_p5 = scmp.lt.s32.totalorder %s1558_s13, %s1554_s9 }
 0x503   : > { %p1556_p2 = pnand %p1555_p1, %p1737_p8 }
 0x504   : > { %p1561_p6 = por %p1560_p5, %p1559_p4 }
 0x505   : > { %p1557_p3 = pneg %p1556_p2 }
 0x507   : > { %p1562_p7 = pnand %p1561_p6, %p1557_p3 }
 0x509   : > { %1565 = shalt.err (!%p1562_p7)
}
 0x50a   : > { %1415 = dma.vmem_to_hbm [thread:$0]  (%p1737_p8), %s1168_s23, 16, %s1165_s20, %s1155_s24  }
 0x50b PF: > { %p1421_p9 = scmp.ge.s32.totalorder %s1634_s12, 2  ;;  %s1179_s25 = sand.u32 1, %s1606_s29  }
 0x50c   : > { %s1180_s26 = scalar_lea.sflag [#allocation10], %s1179_s25 }
 0x50d   : > { %p1418_p10 = pnand %p1421_p9, %p1747_p0 }
 0x50f   : > { %p1419_p11 = pneg %p1418_p10 }
 0x511   : > { %1601 = dma.done.wait (%p1419_p11), %s1180_s26, 16  }
 0x512   : > { %1603 = vsyncadd (%p1419_p11), %s1180_s26, 4294967280  ;;  %s26_s12 = sadd.s32 1, %s1634_s12   ;;  %s1994_s29 = smov %s1610_s30 }
 0x513   : > { %p23_p12 = scmp.ge.s32.totalorder %s26_s12, 6   ;;  %s1995_s30 = smov %s1614_s0 }
 0x514   : > { %s1996_s0 = smov %s1755_s21  ;;  %s1997_s8 = smov %s1626_s10 }
 0x515   : > { %s1998_s9 = smov %s1630_s11  ;;  %s1999_s10 = smov %s2002_s15 }
 0x516   : > { %s2000_s11 = smov %s2006_s16  ;;  %25 = sbr.rel (!%p23_p12) target bundleno = 20 (0x14), region = 99 }
 0x51b   :  { %1184 = vsyncpa [#allocation10], 1 }
 0x51c   :  { %1186 = vsyncpa [#allocation10 + $0x1], 1 }

</bundles_post_ra>
